<compile_context>
chip_gen: v7x
topology: tpu7x:2x2x1
jax: 0.10.0
libtpu: 0.0.40
codegen_flags: <defaults>
</compile_context>

<pallas_src>
import math

import jax
import jax.numpy as jnp
from jax.experimental import pallas as pl
from jax.experimental.pallas import tpu as pltpu

LANE = 128
NEG_SLOPE = 0.01  # PyTorch nn.LeakyReLU default
# LeakyReLU applications after each of the 7 Linear layers (doubled after #1).
_LEAKY_COUNTS = (1, 2, 1, 1, 1, 1, 0)
_NUM_LAYERS = len(_LEAKY_COUNTS)
_TK_MAX = 2048  # K-streaming tile for the first-layer weight


def _round_up(x, m):
    return ((x + m - 1) // m) * m


def _layer0_fin_padding(fin):
    """Padded fan-in for layer 0 and the K tile that divides it exactly."""
    fin_p = _round_up(fin, LANE)
    if fin_p > _TK_MAX:
        fin_p = _round_up(fin, _TK_MAX)
        return fin_p, _TK_MAX
    return fin_p, fin_p


def _leaky(y):
    return jnp.where(y >= 0.0, y, NEG_SLOPE * y)


def _mlp_kernel(x_ref, *refs):
    """Fused 7-layer MLP.

    refs = (w0, b0, w1, b1, ..., w6, b6, o_ref, acc_ref).
    Grid axis 0 streams the K (ndeep) dimension of layer 0.
    """
    o_ref = refs[2 * _NUM_LAYERS]
    acc_ref = refs[2 * _NUM_LAYERS + 1]
    k = pl.program_id(0)
    nk = pl.num_programs(0)

    @pl.when(k == 0)
    def _init():
        acc_ref[...] = jnp.zeros_like(acc_ref)

    # Layer 0: streamed K tile, bf16 x bf16 -> f32 accumulate on the MXU.
    acc_ref[...] += jnp.dot(x_ref[...], refs[0][...],
                            preferred_element_type=jnp.float32)

    @pl.when(k == nk - 1)
    def _finish():
        h = acc_ref[...] + refs[1][...]  # bias add in f32
        for _ in range(_LEAKY_COUNTS[0]):
            h = _leaky(h)
        for layer in range(1, _NUM_LAYERS):
            w_ref = refs[2 * layer]
            b_ref = refs[2 * layer + 1]
            y = jnp.dot(h.astype(w_ref.dtype), w_ref[...],
                        preferred_element_type=jnp.float32)
            y = y + b_ref[...]
            for _ in range(_LEAKY_COUNTS[layer]):
                y = _leaky(y)
            h = y
        o_ref[...] = h.astype(o_ref.dtype)


def init_params(key, ngf, ndeep, dtype=jnp.float32):
    """nn.Linear-style init (U[-1/sqrt(fan_in), 1/sqrt(fan_in)]).

    Weights are stored transposed as [in_features, out_features]."""
    dims = [
        (ndeep, 4 * ngf),
        (4 * ngf, 4 * ngf),
        (4 * ngf, 2 * ngf),
        (2 * ngf, 2 * ngf),
        (2 * ngf, ngf),
        (ngf, ngf),
        (ngf, 1),
    ]
    params = []
    for fin, fout in dims:
        key, kw, kb = jax.random.split(key, 3)
        bound = 1.0 / math.sqrt(fin)
        w = jax.random.uniform(kw, (fin, fout), dtype, -bound, bound)
        b = jax.random.uniform(kb, (fout,), dtype, -bound, bound)
        params.append((w, b))
    return params


def pad_params(params, weight_dtype=jnp.bfloat16):
    """Zero-pad feature dims to lane-dense (x128) sizes; weights -> bf16,
    biases stay f32 (bias add / LeakyReLU run in f32 inside the kernel)."""
    padded = []
    for layer, (w, b) in enumerate(params):
        fin, fout = w.shape
        if layer == 0:
            fin_p, _ = _layer0_fin_padding(fin)
        else:
            fin_p = _round_up(fin, LANE)
        fout_p = _round_up(fout, LANE)
        wp = jnp.pad(w, ((0, fin_p - fin), (0, fout_p - fout))).astype(weight_dtype)
        bp = jnp.pad(b.reshape(1, fout), ((0, 0), (0, fout_p - fout))).astype(jnp.float32)
        padded.append((wp, bp))
    return padded


@jax.jit
def netd_deep_v2_forward(x, padded_params):
    """NetDDeepV2 forward: returns [B] logits (== .view(-1, 1).squeeze(1))."""
    B, fin = x.shape
    w0, b0 = padded_params[0]
    fin_p, fout0_p = w0.shape
    tk = fin_p if fin_p <= _TK_MAX else _TK_MAX
    nk = fin_p // tk
    out_p = padded_params[-1][1].shape[1]

    if fin_p != fin:
        x = jnp.pad(x, ((0, 0), (0, fin_p - fin)))
    x = x.astype(jnp.bfloat16)

    flat = [w0, b0]
    in_specs = [
        pl.BlockSpec((B, tk), lambda k: (0, k)),        # x: K-streamed
        pl.BlockSpec((tk, fout0_p), lambda k: (k, 0)),  # W0: K-streamed
        pl.BlockSpec(b0.shape, lambda k: (0, 0)),       # b0: resident
    ]
    for w, b in padded_params[1:]:
        flat += [w, b]
        in_specs.append(pl.BlockSpec(w.shape, lambda k: (0, 0)))  # resident
        in_specs.append(pl.BlockSpec(b.shape, lambda k: (0, 0)))  # resident

    # Advisory cost: pure weight streaming, memory-dominated.
    flops = 0
    bytes_accessed = B * fin_p * 2 + B * out_p * 4
    for w, b in padded_params:
        flops += 2 * B * w.shape[0] * w.shape[1]
        bytes_accessed += w.size * w.dtype.itemsize + b.size * b.dtype.itemsize

    # Peak VMEM: double-buffered streamed blocks + (conservatively doubled)
    # resident small weights + acc scratch + output, plus headroom.
    vmem_est = (2 * B * tk * 2            # x block, bf16, double-buffered
                + 2 * tk * fout0_p * 2    # W0 block, bf16, double-buffered
                + B * fout0_p * 4         # f32 accumulator scratch
                + 2 * B * out_p * 4)      # output tile
    for i, (w, b) in enumerate(padded_params):
        if i > 0:
            vmem_est += 2 * w.size * w.dtype.itemsize
        vmem_est += 2 * b.size * b.dtype.itemsize
    vmem_limit = int(min(max(2 * vmem_est, 32 * (1 << 20)), 64 * (1 << 20)))

    out = pl.pallas_call(
        _mlp_kernel,
        out_shape=jax.ShapeDtypeStruct((B, out_p), jnp.float32),
        grid_spec=pltpu.PrefetchScalarGridSpec(
            num_scalar_prefetch=0,
            grid=(nk,),
            in_specs=in_specs,
            out_specs=pl.BlockSpec((B, out_p), lambda k: (0, 0)),
            scratch_shapes=[pltpu.VMEM((B, fout0_p), jnp.float32)],
        ),
        compiler_params=pltpu.CompilerParams(
            dimension_semantics=("arbitrary",),   # K is a reduction axis
            vmem_limit_bytes=vmem_limit,
        ),
        cost_estimate=pl.CostEstimate(
            flops=flops, transcendentals=0, bytes_accessed=bytes_accessed),
    )(x, *flat)
    # Lane 0 of the lane-dense padded output is the real 1-wide logit.
    return out[:, 0]


if __name__ == "__main__":
    # Small shapes consistent with the module (defaults are ngf=128, ndeep=6144).
    ngf, ndeep = 32, 256
    batch = 8

    key = jax.random.PRNGKey(0)
    key, kx = jax.random.split(key)
    x = jax.random.normal(kx, (batch, ndeep), dtype=jnp.float32)

    params = init_params(key, ngf, ndeep)           # f32 "PyTorch" params
    padded = pad_params(params)                     # bf16 weights, f32 biases

    out = netd_deep_v2_forward(x, padded)
    out = jax.block_until_ready(out)

    assert out.shape == (batch,), out.shape
    assert out.dtype == jnp.float32

    # Matched-precision plain-JAX reference (bf16-rounded weights/activations,
    # f32 math), exact module semantics incl. the doubled LeakyReLU after the
    # second Linear and the final .view(-1, 1).squeeze(1).
    h = x
    for (w, b), n_leaky in zip(params, _LEAKY_COUNTS):
        h_bf = h.astype(jnp.bfloat16).astype(jnp.float32)
        w_bf = w.astype(jnp.bfloat16).astype(jnp.float32)
        h = h_bf @ w_bf + b
        for _ in range(n_leaky):
            h = jnp.where(h >= 0.0, h, NEG_SLOPE * h)
    ref = h.reshape(-1, 1).squeeze(1)

    assert jnp.allclose(out, ref, atol=1e-3, rtol=1e-3), (out, ref)
    print("KERNEL_OK")
</pallas_src>

<mosaic_0001>
module attributes {stable_mosaic.version = 11 : i64} {
  func.func @_mlp_kernel(%arg0: i32, %arg1: memref<8x256xbf16, #tpu.memory_space<vmem>>, %arg2: memref<256x128xbf16, #tpu.memory_space<vmem>>, %arg3: memref<1x128xf32, #tpu.memory_space<vmem>>, %arg4: memref<128x128xbf16, #tpu.memory_space<vmem>>, %arg5: memref<1x128xf32, #tpu.memory_space<vmem>>, %arg6: memref<128x128xbf16, #tpu.memory_space<vmem>>, %arg7: memref<1x128xf32, #tpu.memory_space<vmem>>, %arg8: memref<128x128xbf16, #tpu.memory_space<vmem>>, %arg9: memref<1x128xf32, #tpu.memory_space<vmem>>, %arg10: memref<128x128xbf16, #tpu.memory_space<vmem>>, %arg11: memref<1x128xf32, #tpu.memory_space<vmem>>, %arg12: memref<128x128xbf16, #tpu.memory_space<vmem>>, %arg13: memref<1x128xf32, #tpu.memory_space<vmem>>, %arg14: memref<128x128xbf16, #tpu.memory_space<vmem>>, %arg15: memref<1x128xf32, #tpu.memory_space<vmem>>, %arg16: memref<8x128xf32, #tpu.memory_space<vmem>>, %arg17: memref<8x128xf32, #tpu.memory_space<vmem>>) attributes {dimension_semantics = [#tpu.dimension_semantics<arbitrary>], iteration_bounds = array<i64: 1>, scalar_prefetch = 0 : i64, scratch_operands = 1 : i64, tpu.core_type = #tpu.core_type<tc>, window_params = [{transform_indices = @transform_0, window_bounds = array<i64: 8, 256>}, {transform_indices = @transform_1, window_bounds = array<i64: 256, 128>}, {pipeline_mode = #tpu.pipeline_mode<synchronous>, transform_indices = @transform_2, window_bounds = array<i64: 1, 128>}, {pipeline_mode = #tpu.pipeline_mode<synchronous>, transform_indices = @transform_3, window_bounds = array<i64: 128, 128>}, {pipeline_mode = #tpu.pipeline_mode<synchronous>, transform_indices = @transform_4, window_bounds = array<i64: 1, 128>}, {pipeline_mode = #tpu.pipeline_mode<synchronous>, transform_indices = @transform_5, window_bounds = array<i64: 128, 128>}, {pipeline_mode = #tpu.pipeline_mode<synchronous>, transform_indices = @transform_6, window_bounds = array<i64: 1, 128>}, {pipeline_mode = #tpu.pipeline_mode<synchronous>, transform_indices = @transform_7, window_bounds = array<i64: 128, 128>}, {pipeline_mode = #tpu.pipeline_mode<synchronous>, transform_indices = @transform_8, window_bounds = array<i64: 1, 128>}, {pipeline_mode = #tpu.pipeline_mode<synchronous>, transform_indices = @transform_9, window_bounds = array<i64: 128, 128>}, {pipeline_mode = #tpu.pipeline_mode<synchronous>, transform_indices = @transform_10, window_bounds = array<i64: 1, 128>}, {pipeline_mode = #tpu.pipeline_mode<synchronous>, transform_indices = @transform_11, window_bounds = array<i64: 128, 128>}, {pipeline_mode = #tpu.pipeline_mode<synchronous>, transform_indices = @transform_12, window_bounds = array<i64: 1, 128>}, {pipeline_mode = #tpu.pipeline_mode<synchronous>, transform_indices = @transform_13, window_bounds = array<i64: 128, 128>}, {pipeline_mode = #tpu.pipeline_mode<synchronous>, transform_indices = @transform_14, window_bounds = array<i64: 1, 128>}, {pipeline_mode = #tpu.pipeline_mode<synchronous>, transform_indices = @transform_15, window_bounds = array<i64: 8, 128>}]} {
    %c0_i32 = arith.constant 0 : i32
    %0 = arith.cmpi eq, %arg0, %c0_i32 : i32
    %1 = arith.extui %0 : i1 to i32
    %c0_i32_0 = arith.constant 0 : i32
    %2 = arith.cmpi ne, %1, %c0_i32_0 : i32
    scf.if %2 {
      %cst_10 = arith.constant 0.000000e+00 : f32
      %12 = vector.broadcast %cst_10 : f32 to vector<8x128xf32>
      %c0_11 = arith.constant 0 : index
      %c0_12 = arith.constant 0 : index
      %13 = vector.load %arg17[%c0_11, %c0_12] : memref<8x128xf32, #tpu.memory_space<vmem>>, vector<8x128xf32>
      tpu.vector_store %arg17[%c0_11, %c0_12], %12 {strides = array<i32>} : memref<8x128xf32, #tpu.memory_space<vmem>>, vector<8x128xf32>,
    } else {
    }
    %c0 = arith.constant 0 : index
    %c0_1 = arith.constant 0 : index
    %3 = vector.load %arg17[%c0, %c0_1] : memref<8x128xf32, #tpu.memory_space<vmem>>, vector<8x128xf32>
    %c0_2 = arith.constant 0 : index
    %c0_3 = arith.constant 0 : index
    %4 = vector.load %arg1[%c0_2, %c0_3] : memref<8x256xbf16, #tpu.memory_space<vmem>>, vector<8x256xbf16>
    %c0_4 = arith.constant 0 : index
    %c0_5 = arith.constant 0 : index
    %5 = vector.load %arg2[%c0_4, %c0_5] : memref<256x128xbf16, #tpu.memory_space<vmem>>, vector<256x128xbf16>
    %cst = arith.constant dense<0.000000e+00> : vector<8x128xf32>
    %6 = tpu.matmul %4, %5, %cst {dimension_numbers = #tpu.dot_dimension_numbers<[1], [0], [0], [1], [0, 0, 1, 1], [], []>} : vector<8x256xbf16>, vector<256x128xbf16>, vector<8x128xf32> -> vector<8x128xf32>
    %7 = arith.addf %3, %6 : vector<8x128xf32>
    %c0_6 = arith.constant 0 : index
    %c0_7 = arith.constant 0 : index
    %8 = vector.load %arg17[%c0_6, %c0_7] : memref<8x128xf32, #tpu.memory_space<vmem>>, vector<8x128xf32>
    tpu.vector_store %arg17[%c0_6, %c0_7], %7 {strides = array<i32>} : memref<8x128xf32, #tpu.memory_space<vmem>>, vector<8x128xf32>,
    %c0_i32_8 = arith.constant 0 : i32
    %9 = arith.cmpi eq, %arg0, %c0_i32_8 : i32
    %10 = arith.extui %9 : i1 to i32
    %c0_i32_9 = arith.constant 0 : i32
    %11 = arith.cmpi ne, %10, %c0_i32_9 : i32
    scf.if %11 {
      %c0_10 = arith.constant 0 : index
      %c0_11 = arith.constant 0 : index
      %12 = vector.load %arg17[%c0_10, %c0_11] : memref<8x128xf32, #tpu.memory_space<vmem>>, vector<8x128xf32>
      %c0_12 = arith.constant 0 : index
      %c0_13 = arith.constant 0 : index
      %13 = vector.load %arg3[%c0_12, %c0_13] : memref<1x128xf32, #tpu.memory_space<vmem>>, vector<1x128xf32>
      %14 = vector.broadcast %13 : vector<1x128xf32> to vector<8x128xf32>
      %15 = arith.addf %12, %14 : vector<8x128xf32>
      %cst_14 = arith.constant 0.000000e+00 : f32
      %16 = vector.broadcast %cst_14 : f32 to vector<8x128xf32>
      %17 = arith.cmpf oge, %15, %16 : vector<8x128xf32>
      %cst_15 = arith.constant 0.00999999977 : f32
      %18 = vector.broadcast %cst_15 : f32 to vector<8x128xf32>
      %19 = arith.mulf %18, %15 : vector<8x128xf32>
      %20 = arith.select %17, %15, %19 : vector<8x128xi1>, vector<8x128xf32>
      %21 = arith.truncf %20 : vector<8x128xf32> to vector<8x128xbf16>
      %c0_16 = arith.constant 0 : index
      %c0_17 = arith.constant 0 : index
      %22 = vector.load %arg4[%c0_16, %c0_17] : memref<128x128xbf16, #tpu.memory_space<vmem>>, vector<128x128xbf16>
      %cst_18 = arith.constant dense<0.000000e+00> : vector<8x128xf32>
      %23 = tpu.matmul %21, %22, %cst_18 {dimension_numbers = #tpu.dot_dimension_numbers<[1], [0], [0], [1], [0, 0, 1, 1], [], []>} : vector<8x128xbf16>, vector<128x128xbf16>, vector<8x128xf32> -> vector<8x128xf32>
      %c0_19 = arith.constant 0 : index
      %c0_20 = arith.constant 0 : index
      %24 = vector.load %arg5[%c0_19, %c0_20] : memref<1x128xf32, #tpu.memory_space<vmem>>, vector<1x128xf32>
      %25 = vector.broadcast %24 : vector<1x128xf32> to vector<8x128xf32>
      %26 = arith.addf %23, %25 : vector<8x128xf32>
      %cst_21 = arith.constant 0.000000e+00 : f32
      %27 = vector.broadcast %cst_21 : f32 to vector<8x128xf32>
      %28 = arith.cmpf oge, %26, %27 : vector<8x128xf32>
      %cst_22 = arith.constant 0.00999999977 : f32
      %29 = vector.broadcast %cst_22 : f32 to vector<8x128xf32>
      %30 = arith.mulf %29, %26 : vector<8x128xf32>
      %31 = arith.select %28, %26, %30 : vector<8x128xi1>, vector<8x128xf32>
      %cst_23 = arith.constant 0.000000e+00 : f32
      %32 = vector.broadcast %cst_23 : f32 to vector<8x128xf32>
      %33 = arith.cmpf oge, %31, %32 : vector<8x128xf32>
      %cst_24 = arith.constant 0.00999999977 : f32
      %34 = vector.broadcast %cst_24 : f32 to vector<8x128xf32>
      %35 = arith.mulf %34, %31 : vector<8x128xf32>
      %36 = arith.select %33, %31, %35 : vector<8x128xi1>, vector<8x128xf32>
      %37 = arith.truncf %36 : vector<8x128xf32> to vector<8x128xbf16>
      %c0_25 = arith.constant 0 : index
      %c0_26 = arith.constant 0 : index
      %38 = vector.load %arg6[%c0_25, %c0_26] : memref<128x128xbf16, #tpu.memory_space<vmem>>, vector<128x128xbf16>
      %cst_27 = arith.constant dense<0.000000e+00> : vector<8x128xf32>
      %39 = tpu.matmul %37, %38, %cst_27 {dimension_numbers = #tpu.dot_dimension_numbers<[1], [0], [0], [1], [0, 0, 1, 1], [], []>} : vector<8x128xbf16>, vector<128x128xbf16>, vector<8x128xf32> -> vector<8x128xf32>
      %c0_28 = arith.constant 0 : index
      %c0_29 = arith.constant 0 : index
      %40 = vector.load %arg7[%c0_28, %c0_29] : memref<1x128xf32, #tpu.memory_space<vmem>>, vector<1x128xf32>
      %41 = vector.broadcast %40 : vector<1x128xf32> to vector<8x128xf32>
      %42 = arith.addf %39, %41 : vector<8x128xf32>
      %cst_30 = arith.constant 0.000000e+00 : f32
      %43 = vector.broadcast %cst_30 : f32 to vector<8x128xf32>
      %44 = arith.cmpf oge, %42, %43 : vector<8x128xf32>
      %cst_31 = arith.constant 0.00999999977 : f32
      %45 = vector.broadcast %cst_31 : f32 to vector<8x128xf32>
      %46 = arith.mulf %45, %42 : vector<8x128xf32>
      %47 = arith.select %44, %42, %46 : vector<8x128xi1>, vector<8x128xf32>
      %48 = arith.truncf %47 : vector<8x128xf32> to vector<8x128xbf16>
      %c0_32 = arith.constant 0 : index
      %c0_33 = arith.constant 0 : index
      %49 = vector.load %arg8[%c0_32, %c0_33] : memref<128x128xbf16, #tpu.memory_space<vmem>>, vector<128x128xbf16>
      %cst_34 = arith.constant dense<0.000000e+00> : vector<8x128xf32>
      %50 = tpu.matmul %48, %49, %cst_34 {dimension_numbers = #tpu.dot_dimension_numbers<[1], [0], [0], [1], [0, 0, 1, 1], [], []>} : vector<8x128xbf16>, vector<128x128xbf16>, vector<8x128xf32> -> vector<8x128xf32>
      %c0_35 = arith.constant 0 : index
      %c0_36 = arith.constant 0 : index
      %51 = vector.load %arg9[%c0_35, %c0_36] : memref<1x128xf32, #tpu.memory_space<vmem>>, vector<1x128xf32>
      %52 = vector.broadcast %51 : vector<1x128xf32> to vector<8x128xf32>
      %53 = arith.addf %50, %52 : vector<8x128xf32>
      %cst_37 = arith.constant 0.000000e+00 : f32
      %54 = vector.broadcast %cst_37 : f32 to vector<8x128xf32>
      %55 = arith.cmpf oge, %53, %54 : vector<8x128xf32>
      %cst_38 = arith.constant 0.00999999977 : f32
      %56 = vector.broadcast %cst_38 : f32 to vector<8x128xf32>
      %57 = arith.mulf %56, %53 : vector<8x128xf32>
      %58 = arith.select %55, %53, %57 : vector<8x128xi1>, vector<8x128xf32>
      %59 = arith.truncf %58 : vector<8x128xf32> to vector<8x128xbf16>
      %c0_39 = arith.constant 0 : index
      %c0_40 = arith.constant 0 : index
      %60 = vector.load %arg10[%c0_39, %c0_40] : memref<128x128xbf16, #tpu.memory_space<vmem>>, vector<128x128xbf16>
      %cst_41 = arith.constant dense<0.000000e+00> : vector<8x128xf32>
      %61 = tpu.matmul %59, %60, %cst_41 {dimension_numbers = #tpu.dot_dimension_numbers<[1], [0], [0], [1], [0, 0, 1, 1], [], []>} : vector<8x128xbf16>, vector<128x128xbf16>, vector<8x128xf32> -> vector<8x128xf32>
      %c0_42 = arith.constant 0 : index
      %c0_43 = arith.constant 0 : index
      %62 = vector.load %arg11[%c0_42, %c0_43] : memref<1x128xf32, #tpu.memory_space<vmem>>, vector<1x128xf32>
      %63 = vector.broadcast %62 : vector<1x128xf32> to vector<8x128xf32>
      %64 = arith.addf %61, %63 : vector<8x128xf32>
      %cst_44 = arith.constant 0.000000e+00 : f32
      %65 = vector.broadcast %cst_44 : f32 to vector<8x128xf32>
      %66 = arith.cmpf oge, %64, %65 : vector<8x128xf32>
      %cst_45 = arith.constant 0.00999999977 : f32
      %67 = vector.broadcast %cst_45 : f32 to vector<8x128xf32>
      %68 = arith.mulf %67, %64 : vector<8x128xf32>
      %69 = arith.select %66, %64, %68 : vector<8x128xi1>, vector<8x128xf32>
      %70 = arith.truncf %69 : vector<8x128xf32> to vector<8x128xbf16>
      %c0_46 = arith.constant 0 : index
      %c0_47 = arith.constant 0 : index
      %71 = vector.load %arg12[%c0_46, %c0_47] : memref<128x128xbf16, #tpu.memory_space<vmem>>, vector<128x128xbf16>
      %cst_48 = arith.constant dense<0.000000e+00> : vector<8x128xf32>
      %72 = tpu.matmul %70, %71, %cst_48 {dimension_numbers = #tpu.dot_dimension_numbers<[1], [0], [0], [1], [0, 0, 1, 1], [], []>} : vector<8x128xbf16>, vector<128x128xbf16>, vector<8x128xf32> -> vector<8x128xf32>
      %c0_49 = arith.constant 0 : index
      %c0_50 = arith.constant 0 : index
      %73 = vector.load %arg13[%c0_49, %c0_50] : memref<1x128xf32, #tpu.memory_space<vmem>>, vector<1x128xf32>
      %74 = vector.broadcast %73 : vector<1x128xf32> to vector<8x128xf32>
      %75 = arith.addf %72, %74 : vector<8x128xf32>
      %cst_51 = arith.constant 0.000000e+00 : f32
      %76 = vector.broadcast %cst_51 : f32 to vector<8x128xf32>
      %77 = arith.cmpf oge, %75, %76 : vector<8x128xf32>
      %cst_52 = arith.constant 0.00999999977 : f32
      %78 = vector.broadcast %cst_52 : f32 to vector<8x128xf32>
      %79 = arith.mulf %78, %75 : vector<8x128xf32>
      %80 = arith.select %77, %75, %79 : vector<8x128xi1>, vector<8x128xf32>
      %81 = arith.truncf %80 : vector<8x128xf32> to vector<8x128xbf16>
      %c0_53 = arith.constant 0 : index
      %c0_54 = arith.constant 0 : index
      %82 = vector.load %arg14[%c0_53, %c0_54] : memref<128x128xbf16, #tpu.memory_space<vmem>>, vector<128x128xbf16>
      %cst_55 = arith.constant dense<0.000000e+00> : vector<8x128xf32>
      %83 = tpu.matmul %81, %82, %cst_55 {dimension_numbers = #tpu.dot_dimension_numbers<[1], [0], [0], [1], [0, 0, 1, 1], [], []>} : vector<8x128xbf16>, vector<128x128xbf16>, vector<8x128xf32> -> vector<8x128xf32>
      %c0_56 = arith.constant 0 : index
      %c0_57 = arith.constant 0 : index
      %84 = vector.load %arg15[%c0_56, %c0_57] : memref<1x128xf32, #tpu.memory_space<vmem>>, vector<1x128xf32>
      %85 = vector.broadcast %84 : vector<1x128xf32> to vector<8x128xf32>
      %86 = arith.addf %83, %85 : vector<8x128xf32>
      %c0_58 = arith.constant 0 : index
      %c0_59 = arith.constant 0 : index
      %87 = vector.load %arg16[%c0_58, %c0_59] : memref<8x128xf32, #tpu.memory_space<vmem>>, vector<8x128xf32>
      tpu.vector_store %arg16[%c0_58, %c0_59], %86 {strides = array<i32>} : memref<8x128xf32, #tpu.memory_space<vmem>>, vector<8x128xf32>,
    } else {
    }
    return
  }
  func.func @transform_0(%arg0: i32) -> (i32, i32) {
    %c0_i32 = arith.constant 0 : i32
    %c0_i32_0 = arith.constant 0 : i32
    return %c0_i32, %arg0 : i32, i32
  }
  func.func @transform_1(%arg0: i32) -> (i32, i32) {
    %c0_i32 = arith.constant 0 : i32
    %c0_i32_0 = arith.constant 0 : i32
    return %arg0, %c0_i32 : i32, i32
  }
  func.func @transform_2(%arg0: i32) -> (i32, i32) {
    %c0_i32 = arith.constant 0 : i32
    %c0_i32_0 = arith.constant 0 : i32
    %c0_i32_1 = arith.constant 0 : i32
    return %c0_i32, %c0_i32_0 : i32, i32
  }
  func.func @transform_3(%arg0: i32) -> (i32, i32) {
    %c0_i32 = arith.constant 0 : i32
    %c0_i32_0 = arith.constant 0 : i32
    %c0_i32_1 = arith.constant 0 : i32
    return %c0_i32, %c0_i32_0 : i32, i32
  }
  func.func @transform_4(%arg0: i32) -> (i32, i32) {
    %c0_i32 = arith.constant 0 : i32
    %c0_i32_0 = arith.constant 0 : i32
    %c0_i32_1 = arith.constant 0 : i32
    return %c0_i32, %c0_i32_0 : i32, i32
  }
  func.func @transform_5(%arg0: i32) -> (i32, i32) {
    %c0_i32 = arith.constant 0 : i32
    %c0_i32_0 = arith.constant 0 : i32
    %c0_i32_1 = arith.constant 0 : i32
    return %c0_i32, %c0_i32_0 : i32, i32
  }
  func.func @transform_6(%arg0: i32) -> (i32, i32) {
    %c0_i32 = arith.constant 0 : i32
    %c0_i32_0 = arith.constant 0 : i32
    %c0_i32_1 = arith.constant 0 : i32
    return %c0_i32, %c0_i32_0 : i32, i32
  }
  func.func @transform_7(%arg0: i32) -> (i32, i32) {
    %c0_i32 = arith.constant 0 : i32
    %c0_i32_0 = arith.constant 0 : i32
    %c0_i32_1 = arith.constant 0 : i32
    return %c0_i32, %c0_i32_0 : i32, i32
  }
  func.func @transform_8(%arg0: i32) -> (i32, i32) {
    %c0_i32 = arith.constant 0 : i32
    %c0_i32_0 = arith.constant 0 : i32
    %c0_i32_1 = arith.constant 0 : i32
    return %c0_i32, %c0_i32_0 : i32, i32
  }
  func.func @transform_9(%arg0: i32) -> (i32, i32) {
    %c0_i32 = arith.constant 0 : i32
    %c0_i32_0 = arith.constant 0 : i32
    %c0_i32_1 = arith.constant 0 : i32
    return %c0_i32, %c0_i32_0 : i32, i32
  }
  func.func @transform_10(%arg0: i32) -> (i32, i32) {
    %c0_i32 = arith.constant 0 : i32
    %c0_i32_0 = arith.constant 0 : i32
    %c0_i32_1 = arith.constant 0 : i32
    return %c0_i32, %c0_i32_0 : i32, i32
  }
  func.func @transform_11(%arg0: i32) -> (i32, i32) {
    %c0_i32 = arith.constant 0 : i32
    %c0_i32_0 = arith.constant 0 : i32
    %c0_i32_1 = arith.constant 0 : i32
    return %c0_i32, %c0_i32_0 : i32, i32
  }
  func.func @transform_12(%arg0: i32) -> (i32, i32) {
    %c0_i32 = arith.constant 0 : i32
    %c0_i32_0 = arith.constant 0 : i32
    %c0_i32_1 = arith.constant 0 : i32
    return %c0_i32, %c0_i32_0 : i32, i32
  }
  func.func @transform_13(%arg0: i32) -> (i32, i32) {
    %c0_i32 = arith.constant 0 : i32
    %c0_i32_0 = arith.constant 0 : i32
    %c0_i32_1 = arith.constant 0 : i32
    return %c0_i32, %c0_i32_0 : i32, i32
  }
  func.func @transform_14(%arg0: i32) -> (i32, i32) {
    %c0_i32 = arith.constant 0 : i32
    %c0_i32_0 = arith.constant 0 : i32
    %c0_i32_1 = arith.constant 0 : i32
    return %c0_i32, %c0_i32_0 : i32, i32
  }
  func.func @transform_15(%arg0: i32) -> (i32, i32) {
    %c0_i32 = arith.constant 0 : i32
    %c0_i32_0 = arith.constant 0 : i32
    %c0_i32_1 = arith.constant 0 : i32
    return %c0_i32, %c0_i32_0 : i32, i32
  }
}

</mosaic_0001>

<bundles_post_ra>
// kernel: netd_deep_v2_forward.1
= control target key start
LH: loop header
LB: loop body
LE: loop exit
PB: predicated region body
PF: predicated region fallthrough
CT: control target
= control target key end

     0   :  { %20 = vsyncpa [#allocation4], 0  ;;  %s2012_s0 = inlined_call_operand.vmem [shape: bf16[8,256], index: 0, kind: input, shape index: {}]   ;;  %s2013_s1 = inlined_call_operand.hbm [shape: bf16[256,128], index: 1, kind: input, shape index: {}]   ;;  %s2014_s2 = inlined_call_operand.vmem [shape: f32[1,128], index: 2, kind: input, shape index: {}]   ;;  %s2015_s3 = inlined_call_operand.hbm [shape: bf16[128,128], index: 3, kind: input, shape index: {}]   ;;  %s2016_s4 = inlined_call_operand.hbm [shape: f32[1,128], index: 4, kind: input, shape index: {}]   ;;  %s2017_s5 = inlined_call_operand.hbm [shape: bf16[128,128], index: 5, kind: input, shape index: {}]   ;;  %s2018_s6 = inlined_call_operand.hbm [shape: f32[1,128], index: 6, kind: input, shape index: {}]   ;;  %s2019_s7 = inlined_call_operand.hbm [shape: bf16[128,128], index: 7, kind: input, shape index: {}]   ;;  %s2020_s8 = inlined_call_operand.hbm [shape: f32[1,128], index: 8, kind: input, shape index: {}]   ;;  %s2021_s9 = inlined_call_operand.hbm [shape: bf16[128,128], index: 9, kind: input, shape index: {}]   ;;  %s2022_s10 = inlined_call_operand.hbm [shape: f32[1,128], index: 10, kind: input, shape index: {}]   ;;  %s2023_s11 = inlined_call_operand.vmem [shape: bf16[128,128], index: 11, kind: input, shape index: {}]   ;;  %s2024_s12 = inlined_call_operand.vmem [shape: f32[1,128], index: 12, kind: input, shape index: {}]   ;;  %s2025_s13 = inlined_call_operand.hbm [shape: bf16[128,128], index: 13, kind: input, shape index: {}]   ;;  %s2026_s14 = inlined_call_operand.vmem [shape: f32[1,128], index: 14, kind: input, shape index: {}]   ;;  %s2027_s15 = inlined_call_operand.vmem [shape: f32[8,128], index: 15, kind: output, shape index: {}]  }
   0x1   :  { %21 = vsyncpa [#allocation6], 0 }
   0x2   :  { %22 = vsyncpa [#allocation9], 0 }
   0x3   :  { %23 = vsyncpa [#allocation12], 0 }
   0x4   :  { %24 = vsyncpa [#allocation15], 0 }
   0x5   :  { %25 = vsyncpa [#allocation18], 0  ;;  %s1660_s18 = smov [#allocation5]   ;;  %s1661_s20 = smov [#allocation8]  }
   0x6   :  { %s47_s19 = sshll.u32 %s1660_s18, 4  ;;  %s69_s21 = sshll.u32 %s1661_s20, 4  ;;  %s48_s19 = int_to_ptr.vmem [resolvable:$true] %s47_s19  ;;  %s1754_s21 = int_to_ptr.vmem [resolvable:$true] %s69_s21 }
   0x7   :  { %s1428_s24 = scalar_lea.hbm %s2015_s3, 1024 }
   0x8   :  { %p1429_p0 = scmp.ne.s32.totalorder %s2015_s3, %s1428_s24  ;;  %p1432_p1 = scmp.lt.u32.totalorder %s1428_s24, %s2015_s3 }
   0xa   :  { %p1434_p2 = pnand %p1432_p1, %p1429_p0 }
   0xc   :  { %1437 = shalt.err (!%p1434_p2)
}
   0xd   :  { %s1438_s29 = scalar_lea.vmem %s48_s19, 1024  ;;  %p1443_p4 = scmp.lt.s32.totalorder %s48_s19, %s48_s19 }
   0xe   :  { %p1439_p3 = scmp.ne.s32.totalorder %s48_s19, %s1438_s29  ;;  %p1444_p5 = scmp.lt.s32.totalorder %s1438_s29, %s1438_s29 }
  0x10   :  { %p1445_p6 = por %p1444_p5, %p1443_p4 }
  0x12   :  { %p1446_p7 = pnand %p1445_p6, %p1439_p3 }
  0x14   :  { %1449 = shalt.err (!%p1446_p7)
}
  0x15   :  { %s1662_s30 = smov 64   ;;  %s1663_s16 = smov 4  }
  0x16   :  { %53 = dma.hbm_to_vmem [thread:$0]  %s2015_s3, 1024, %s48_s19, [#allocation6], %s1662_s30, %s1662_s30, %s1663_s16  }
  0x17   :  { %s1450_s23 = scalar_lea.hbm %s2017_s5, 1024 }
  0x18   :  { %p1451_p8 = scmp.ne.s32.totalorder %s2017_s5, %s1450_s23  ;;  %p1454_p9 = scmp.lt.u32.totalorder %s1450_s23, %s2017_s5 }
  0x1a   :  { %p1456_p10 = pnand %p1454_p9, %p1451_p8 }
  0x1c   :  { %1459 = shalt.err (!%p1456_p10)
}
  0x1d   :  { %s1460_s28 = scalar_lea.vmem %s1754_s21, 1024  ;;  %p1465_p12 = scmp.lt.s32.totalorder %s1754_s21, %s1754_s21 }
  0x1e   :  { %p1461_p11 = scmp.ne.s32.totalorder %s1754_s21, %s1460_s28  ;;  %p1466_p13 = scmp.lt.s32.totalorder %s1460_s28, %s1460_s28 }
  0x20   :  { %p1467_p0 = por %p1466_p13, %p1465_p12 }
  0x22   :  { %p1468_p1 = pnand %p1467_p0, %p1461_p11 }
  0x24   :  { %1471 = shalt.err (!%p1468_p1)
}
  0x25   :  { %75 = dma.hbm_to_vmem [thread:$0]  %s2017_s5, 1024, %s1754_s21, [#allocation9], %s1662_s30, %s1662_s30, %s1663_s16  }
  0x26   :  { %s1664_s29 = smov [#allocation11]   ;;  %s1665_s18 = smov [#allocation14]  }
  0x27   :  { %s91_s17 = sshll.u32 %s1664_s29, 4  ;;  %s113_s20 = sshll.u32 %s1665_s18, 4  ;;  %s92_s17 = int_to_ptr.vmem [resolvable:$true] %s91_s17  ;;  %s1791_s20 = int_to_ptr.vmem [resolvable:$true] %s113_s20 }
  0x28   :  { %s1472_s24 = scalar_lea.hbm %s2019_s7, 1024 }
  0x29   :  { %p1473_p2 = scmp.ne.s32.totalorder %s2019_s7, %s1472_s24  ;;  %p1476_p3 = scmp.lt.u32.totalorder %s1472_s24, %s2019_s7 }
  0x2b   :  { %p1478_p4 = pnand %p1476_p3, %p1473_p2 }
  0x2d   :  { %1481 = shalt.err (!%p1478_p4)
}
  0x2e   :  { %s1482_s5 = scalar_lea.vmem %s92_s17, 1024  ;;  %p1487_p6 = scmp.lt.s32.totalorder %s92_s17, %s92_s17 }
  0x2f   :  { %p1483_p5 = scmp.ne.s32.totalorder %s92_s17, %s1482_s5  ;;  %p1488_p7 = scmp.lt.s32.totalorder %s1482_s5, %s1482_s5 }
  0x31   :  { %p1489_p8 = por %p1488_p7, %p1487_p6 }
  0x33   :  { %p1490_p9 = pnand %p1489_p8, %p1483_p5 }
  0x35   :  { %1493 = shalt.err (!%p1490_p9)
}
  0x36   :  { %97 = dma.hbm_to_vmem [thread:$0]  %s2019_s7, 1024, %s92_s17, [#allocation12], %s1662_s30, %s1662_s30, %s1663_s16  }
  0x37   :  { %s1494_s18 = scalar_lea.hbm %s2021_s9, 1024 }
  0x38   :  { %p1495_p10 = scmp.ne.s32.totalorder %s2021_s9, %s1494_s18  ;;  %p1498_p11 = scmp.lt.u32.totalorder %s1494_s18, %s2021_s9 }
  0x3a   :  { %p1500_p12 = pnand %p1498_p11, %p1495_p10 }
  0x3c   :  { %1503 = shalt.err (!%p1500_p12)
}
  0x3d   :  { %s1504_s26 = scalar_lea.vmem %s1791_s20, 1024  ;;  %p1509_p0 = scmp.lt.s32.totalorder %s1791_s20, %s1791_s20 }
  0x3e   :  { %p1505_p13 = scmp.ne.s32.totalorder %s1791_s20, %s1504_s26  ;;  %p1510_p1 = scmp.lt.s32.totalorder %s1504_s26, %s1504_s26 }
  0x40   :  { %p1511_p2 = por %p1510_p1, %p1509_p0 }
  0x42   :  { %p1512_p3 = pnand %p1511_p2, %p1505_p13 }
  0x44   :  { %1515 = shalt.err (!%p1512_p3)
}
  0x45   :  { %119 = dma.hbm_to_vmem [thread:$0]  %s2021_s9, 1024, %s1791_s20, [#allocation15], %s1662_s30, %s1662_s30, %s1663_s16  }
  0x46   :  { %s1666_s27 = smov [#allocation3]   ;;  %s1667_s5 = smov [#allocation7]  }
  0x47   :  { %s33_s28 = sshll.u32 %s1666_s27, 4  ;;  %s60_s21 = sshll.u32 %s1667_s5, 4  ;;  %s34_s28 = int_to_ptr.vmem [resolvable:$true] %s33_s28  ;;  %s61_s21 = int_to_ptr.vmem [resolvable:$true] %s60_s21 }
  0x48   :  { %s1516_s29 = scalar_lea.hbm %s2013_s1, 2048 }
  0x49   :  { %p1517_p4 = scmp.ne.s32.totalorder %s2013_s1, %s1516_s29  ;;  %p1520_p5 = scmp.lt.u32.totalorder %s1516_s29, %s2013_s1 }
  0x4b   :  { %p1522_p6 = pnand %p1520_p5, %p1517_p4 }
  0x4d   :  { %1525 = shalt.err (!%p1522_p6)
}
  0x4e   :  { %s1526_s9 = scalar_lea.vmem %s34_s28, 2048  ;;  %p1531_p8 = scmp.lt.s32.totalorder %s34_s28, %s34_s28 }
  0x4f   :  { %p1527_p7 = scmp.ne.s32.totalorder %s34_s28, %s1526_s9  ;;  %p1532_p9 = scmp.lt.s32.totalorder %s1526_s9, %s1526_s9 }
  0x51   :  { %p1533_p10 = por %p1532_p9, %p1531_p8 }
  0x53   :  { %p1534_p11 = pnand %p1533_p10, %p1527_p7 }
  0x55   :  { %1537 = shalt.err (!%p1534_p11)
}
  0x56   :  { %39 = dma.hbm_to_vmem [thread:$0]  %s2013_s1, 2048, %s34_s28, [#allocation4], %s1662_s30, %s1662_s30, %s1663_s16  }
  0x57   :  { %s1538_s17 = scalar_lea.hbm %s2016_s4, 16 }
  0x58   :  { %p1539_p12 = scmp.ne.s32.totalorder %s2016_s4, %s1538_s17  ;;  %p1542_p13 = scmp.lt.u32.totalorder %s1538_s17, %s2016_s4 }
  0x5a   :  { %p1544_p0 = pnand %p1542_p13, %p1539_p12 }
  0x5c   :  { %1547 = shalt.err (!%p1544_p0)
}
  0x5d   :  { %s1548_s29 = scalar_lea.vmem %s61_s21, 16  ;;  %s1552_s18 = scalar_lea.vmem %s61_s21, 32 }
  0x5e   :  { %p1549_p1 = scmp.ne.s32.totalorder %s61_s21, %s1548_s29  ;;  %p1553_p2 = scmp.lt.s32.totalorder %s61_s21, %s61_s21 }
  0x5f   :  { %p1554_p3 = scmp.lt.s32.totalorder %s1552_s18, %s1548_s29 }
  0x61   :  { %p1555_p4 = por %p1554_p3, %p1553_p2 }
  0x63   :  { %p1556_p5 = pnand %p1555_p4, %p1549_p1 }
  0x65   :  { %1559 = shalt.err (!%p1556_p5)
}
  0x66   :  { %63 = dma.hbm_to_vmem [thread:$0]  %s2016_s4, 16, %s61_s21, [#allocation6]  }
  0x67   :  { %s1668_s22 = smov [#allocation10]   ;;  %s1669_s24 = smov [#allocation13]  }
  0x68   :  { %s82_s23 = sshll.u32 %s1668_s22, 4  ;;  %s104_s9 = sshll.u32 %s1669_s24, 4  ;;  %s83_s23 = int_to_ptr.vmem [resolvable:$true] %s82_s23  ;;  %s105_s9 = int_to_ptr.vmem [resolvable:$true] %s104_s9 }
  0x69   :  { %s1560_s26 = scalar_lea.hbm %s2018_s6, 16 }
  0x6a   :  { %p1561_p6 = scmp.ne.s32.totalorder %s2018_s6, %s1560_s26  ;;  %p1564_p7 = scmp.lt.u32.totalorder %s1560_s26, %s2018_s6 }
  0x6c   :  { %p1566_p8 = pnand %p1564_p7, %p1561_p6 }
  0x6e   :  { %1569 = shalt.err (!%p1566_p8)
}
  0x6f   :  { %s1570_s4 = scalar_lea.vmem %s83_s23, 16  ;;  %s1574_s21 = scalar_lea.vmem %s83_s23, 32 }
  0x70   :  { %p1571_p9 = scmp.ne.s32.totalorder %s83_s23, %s1570_s4  ;;  %p1575_p10 = scmp.lt.s32.totalorder %s83_s23, %s83_s23 }
  0x71   :  { %p1576_p11 = scmp.lt.s32.totalorder %s1574_s21, %s1570_s4 }
  0x73   :  { %p1577_p12 = por %p1576_p11, %p1575_p10 }
  0x75   :  { %p1578_p13 = pnand %p1577_p12, %p1571_p9 }
  0x77   :  { %1581 = shalt.err (!%p1578_p13)
}
  0x78   :  { %85 = dma.hbm_to_vmem [thread:$0]  %s2018_s6, 16, %s83_s23, [#allocation9]  }
  0x79   :  { %s1582_s1 = scalar_lea.hbm %s2020_s8, 16 }
  0x7a   :  { %p1583_p0 = scmp.ne.s32.totalorder %s2020_s8, %s1582_s1  ;;  %p1586_p1 = scmp.lt.u32.totalorder %s1582_s1, %s2020_s8 }
  0x7c   :  { %p1588_p2 = pnand %p1586_p1, %p1583_p0 }
  0x7e   :  { %1591 = shalt.err (!%p1588_p2)
}
  0x7f   :  { %s1592_s25 = scalar_lea.vmem %s105_s9, 16  ;;  %s1596_s26 = scalar_lea.vmem %s105_s9, 32 }
  0x80   :  { %p1593_p3 = scmp.ne.s32.totalorder %s105_s9, %s1592_s25  ;;  %p1597_p4 = scmp.lt.s32.totalorder %s105_s9, %s105_s9 }
  0x81   :  { %p1598_p5 = scmp.lt.s32.totalorder %s1596_s26, %s1592_s25 }
  0x83   :  { %p1599_p6 = por %p1598_p5, %p1597_p4 }
  0x85   :  { %p1600_p7 = pnand %p1599_p6, %p1593_p3 }
  0x87   :  { %1603 = shalt.err (!%p1600_p7)
}
  0x88   :  { %107 = dma.hbm_to_vmem [thread:$0]  %s2020_s8, 16, %s105_s9, [#allocation12]  }
  0x89   :  { %s1670_s7 = smov [#allocation16]   ;;  %s1671_s27 = smov [#allocation17]  }
  0x8a   :  { %s126_s17 = sshll.u32 %s1670_s7, 4  ;;  %s139_s5 = sshll.u32 %s1671_s27, 4  ;;  %s127_s17 = int_to_ptr.vmem [resolvable:$true] %s126_s17  ;;  %s1879_s5 = int_to_ptr.vmem [resolvable:$true] %s139_s5 }
  0x8b   :  { %s1604_s3 = scalar_lea.hbm %s2022_s10, 16 }
  0x8c   :  { %p1605_p8 = scmp.ne.s32.totalorder %s2022_s10, %s1604_s3  ;;  %p1608_p9 = scmp.lt.u32.totalorder %s1604_s3, %s2022_s10 }
  0x8e   :  { %p1610_p10 = pnand %p1608_p9, %p1605_p8 }
  0x90   :  { %1613 = shalt.err (!%p1610_p10)
}
  0x91   :  { %s1614_s8 = scalar_lea.vmem %s127_s17, 16  ;;  %s1618_s9 = scalar_lea.vmem %s127_s17, 32 }
  0x92   :  { %p1615_p11 = scmp.ne.s32.totalorder %s127_s17, %s1614_s8  ;;  %p1619_p12 = scmp.lt.s32.totalorder %s127_s17, %s127_s17 }
  0x93   :  { %p1620_p13 = scmp.lt.s32.totalorder %s1618_s9, %s1614_s8 }
  0x95   :  { %p1621_p0 = por %p1620_p13, %p1619_p12 }
  0x97   :  { %p1622_p1 = pnand %p1621_p0, %p1615_p11 }
  0x99   :  { %1625 = shalt.err (!%p1622_p1)
}
  0x9a   :  { %129 = dma.hbm_to_vmem [thread:$0]  %s2022_s10, 16, %s127_s17, [#allocation15]  }
  0x9b   :  { %s1626_s25 = scalar_lea.hbm %s2025_s13, 1024 }
  0x9c   :  { %p1627_p2 = scmp.ne.s32.totalorder %s2025_s13, %s1626_s25  ;;  %p1630_p3 = scmp.lt.u32.totalorder %s1626_s25, %s2025_s13 }
  0x9e   :  { %p1632_p4 = pnand %p1630_p3, %p1627_p2 }
  0xa0   :  { %1635 = shalt.err (!%p1632_p4)
}
  0xa1   :  { %s1636_s27 = scalar_lea.vmem %s1879_s5, 1024  ;;  %p1641_p6 = scmp.lt.s32.totalorder %s1879_s5, %s1879_s5 }
  0xa2   :  { %p1637_p5 = scmp.ne.s32.totalorder %s1879_s5, %s1636_s27  ;;  %p1642_p7 = scmp.lt.s32.totalorder %s1636_s27, %s1636_s27 }
  0xa4   :  { %p1643_p8 = por %p1642_p7, %p1641_p6 }
  0xa6   :  { %p1644_p9 = pnand %p1643_p8, %p1637_p5 }
  0xa8   :  { %1647 = shalt.err (!%p1644_p9)
}
  0xa9   :  { %145 = dma.hbm_to_vmem [thread:$0]  %s2025_s13, 1024, %s1879_s5, [#allocation18], %s1662_s30, %s1662_s30, %s1663_s16  }
  0xaa   :  { %1648 = dma.done.wait [#allocation4], 2048  }
  0xab   :  { %1649 = vsyncadd [#allocation4], 4294965248 }
  0xac   :  { %1650 = dma.done.wait [#allocation6], 1040  }
  0xad   :  { %1651 = vsyncadd [#allocation6], 4294966256 }
  0xae   :  { %1652 = dma.done.wait [#allocation9], 1040  }
  0xaf   :  { %1653 = vsyncadd [#allocation9], 4294966256 }
  0xb0   :  { %1654 = dma.done.wait [#allocation12], 1040  }
  0xb1   :  { %1655 = vsyncadd [#allocation12], 4294966256 }
  0xb2   :  { %1656 = dma.done.wait [#allocation15], 1040  }
  0xb3   :  { %1657 = vsyncadd [#allocation15], 4294966256 }
  0xb4   :  { %1658 = dma.done.wait [#allocation18], 1024  }
  0xb5   :  { %1659 = vsyncadd [#allocation18], 4294966272  ;;  %v1672_v0 = vmov 0.0   ;;  %v1362_v1 = vld [vmem:[#allocation3 + $0x40] sm:$0xff]   ;;  %v1364_v3 = vld [vmem:[#allocation3 + $0x48] sm:$0xff]   ;;  %vm1673_vm0 = vmmov 0  }
  0xb6   :  { %1228 = vmatprep.subr.bf16.mxu1 %v1672_v0  ;;  %v1363_v2 = vld [vmem:[#allocation3] sm:$0xff]   ;;  %1152 = vmatprep.subr.bf16.mxu0 %v1362_v1  ;;  %v1365_v4 = vld [vmem:[#allocation3 + $0x8] sm:$0xff]   ;;  %v1366_v5 = vld [vmem:[#allocation3 + $0x50] sm:$0xff]  }
  0xb7   :  { %1153 = vmatpush3.bf16.msra.mxu0 %v1363_v2  ;;  %v1367_v6 = vld [vmem:[#allocation3 + $0x10] sm:$0xff]   ;;  %v1368_v7 = vld [vmem:[#allocation3 + $0x58] sm:$0xff]   ;;  %v1370_v9 = vld [vmem:[#allocation3 + $0x60] sm:$0xff]   ;;  %1244 = vmatprep.mubr.msk.bf16.mxu1 %vm1673_vm0, %v1672_v0 }
  0xb8   :  { %1154 = vmatprep.subr.bf16.mxu0 %v1364_v3  ;;  %v1369_v8 = vld [vmem:[#allocation3 + $0x18] sm:$0xff]   ;;  %v1371_v10 = vld [vmem:[#allocation3 + $0x20] sm:$0xff]   ;;  %v1372_v11 = vld [vmem:[#allocation3 + $0x68] sm:$0xff]  }
  0xb9   :  { %v185_v12 = vld [vmem:[%s2012_s0] sm:$0xff]  ;;  %v1373_v15 = vld [vmem:[#allocation3 + $0x28] sm:$0xff]   ;;  %v1374_v16 = vld [vmem:[#allocation3 + $0x70] sm:$0xff]  }
  0xba   :  { %v1080_v13 = vcombine.high %v185_v12, %v185_v12  ;;  %v1380_v14 = vld [vmem:[#allocation5] sm:$0xff]   ;;  %v1381_v17 = vld [vmem:[#allocation5 + $0x8] sm:$0xff]   ;;  %v1375_v18 = vld [vmem:[#allocation3 + $0x30] sm:$0xff]   ;;  %v1079_v23 = vcombine.low %v185_v12, %v185_v12 }
  0xbb   :  { %1155 = vmatpush3.bf16.msra.mxu0 %v1365_v4  ;;  %1229 = vmatpush3.bf16.msra.mxu1 %v1380_v14  ;;  %v1376_v19 = vld [vmem:[#allocation3 + $0x78] sm:$0xff]   ;;  %v1382_v20 = vld [vmem:[#allocation5 + $0x10] sm:$0xff]   ;;  %v1384_v24 = vld [vmem:[#allocation5 + $0x20] sm:$0xff]  }
  0xbc   :  { %1156 = vmatprep.subr.bf16.mxu0 %v1366_v5  ;;  %353 = vmatprep.mubr.bf16.mxu0 %v1080_v13  ;;  %v1377_v21 = vld [vmem:[#allocation3 + $0x38] sm:$0xff]   ;;  %v1385_v25 = vld [vmem:[#allocation5 + $0x28] sm:$0xff]   ;;  %v1386_v26 = vld [vmem:[#allocation5 + $0x30] sm:$0xff]  }
  0xbd   :  { %1230 = vmatprep.subr.bf16.mxu1 %v1672_v0  ;;  %v1383_v22 = vld [vmem:[#allocation5 + $0x18] sm:$0xff]   ;;  %v1388_v28 = vld [vmem:[#allocation8] sm:$0xff]   ;;  %v1389_v29 = vld [vmem:[#allocation8 + $0x8] sm:$0xff]  }
  0xbe   :  { %v1387_v27 = vld [vmem:[#allocation5 + $0x38] sm:$0xff]   ;;  %v1392_v32 = vld [vmem:[#allocation8 + $0x20] sm:$0xff]   ;;  %v1097_v35 = vld [vmem:[%s2014_s2] ss:$0 sm:$0xff] }
  0xbf   :  { %1157 = vmatpush3.bf16.msra.mxu0 %v1367_v6  ;;  %1231 = vmatpush3.bf16.msra.mxu1 %v1381_v17  ;;  %v1390_v30 = vld [vmem:[#allocation8 + $0x10] sm:$0xff]   ;;  %v1391_v31 = vld [vmem:[#allocation8 + $0x18] sm:$0xff]   ;;  %v1393_v43 = vld [vmem:[#allocation8 + $0x28] sm:$0xff]  }
  0xc0   :  { %1158 = vmatprep.subr.bf16.mxu0 %v1368_v7  ;;  %1232 = vmatprep.subr.bf16.mxu1 %v1672_v0  ;;  %v1394_v44 = vld [vmem:[#allocation8 + $0x30] sm:$0xff]   ;;  %v1395_v45 = vld [vmem:[#allocation8 + $0x38] sm:$0xff]   ;;  %v1396_v46 = vld [vmem:[#allocation11] sm:$0xff]  }
  0xc1   :  { %v1397_v47 = vld [vmem:[#allocation11 + $0x8] sm:$0xff]   ;;  %v1398_v48 = vld [vmem:[#allocation11 + $0x10] sm:$0xff]   ;;  %v1399_v49 = vld [vmem:[#allocation11 + $0x18] sm:$0xff]  }
  0xc2   :  { %v1400_v50 = vld [vmem:[#allocation11 + $0x20] sm:$0xff]   ;;  %v1401_v51 = vld [vmem:[#allocation11 + $0x28] sm:$0xff]   ;;  %v1098_v52 = vld [vmem:[#allocation7] ss:$0 sm:$0xff] }
  0xc3   :  { %1159 = vmatpush3.bf16.msra.mxu0 %v1369_v8  ;;  %1233 = vmatpush3.bf16.msra.mxu1 %v1382_v20  ;;  %v1402_v63 = vld [vmem:[#allocation11 + $0x30] sm:$0xff]   ;;  %v1403_v1 = vld [vmem:[#allocation11 + $0x38] sm:$0xff]   ;;  %v1404_v2 = vld [vmem:[#allocation14] sm:$0xff]  }
  0xc4   :  { %1160 = vmatprep.subr.bf16.mxu0 %v1370_v9  ;;  %1234 = vmatprep.subr.bf16.mxu1 %v1672_v0  ;;  %v1405_v3 = vld [vmem:[#allocation14 + $0x8] sm:$0xff]   ;;  %v1406_v4 = vld [vmem:[#allocation14 + $0x10] sm:$0xff]   ;;  %v1407_v5 = vld [vmem:[#allocation14 + $0x18] sm:$0xff]  }
  0xc5   :  { %v1408_v6 = vld [vmem:[#allocation14 + $0x20] sm:$0xff]   ;;  %v1409_v7 = vld [vmem:[#allocation14 + $0x28] sm:$0xff]   ;;  %v1107_v8 = vld [vmem:[#allocation10] ss:$0 sm:$0xff] }
  0xc6   :  { %v1410_v17 = vld [vmem:[#allocation14 + $0x30] sm:$0xff]   ;;  %v1413_v20 = vld [vmem:[%s2023_s11 + $0x8] sm:$0xff]  }
  0xc7   :  { %1161 = vmatpush3.bf16.msra.mxu0 %v1371_v10  ;;  %1235 = vmatpush3.bf16.msra.mxu1 %v1383_v22  ;;  %v1415_v22 = vld [vmem:[%s2023_s11 + $0x18] sm:$0xff]  }
  0xc8   :  { %1162 = vmatprep.subr.bf16.mxu0 %v1372_v11  ;;  %1236 = vmatprep.subr.bf16.mxu1 %v1672_v0 }
  0xcb   :  { %1163 = vmatpush3.bf16.msra.mxu0 %v1373_v15  ;;  %1237 = vmatpush3.bf16.msra.mxu1 %v1384_v24  ;;  %v1417_v24 = vld [vmem:[%s2023_s11 + $0x28] sm:$0xff]  }
  0xcc   :  { %1164 = vmatprep.subr.bf16.mxu0 %v1374_v16  ;;  %1238 = vmatprep.subr.bf16.mxu1 %v1672_v0 }
  0xcf   :  { %1165 = vmatpush3.bf16.msra.mxu0 %v1375_v18  ;;  %1239 = vmatpush3.bf16.msra.mxu1 %v1385_v25  ;;  %v1411_v18 = vld [vmem:[#allocation14 + $0x38] sm:$0xff]  }
  0xd0   :  { %1166 = vmatprep.subr.bf16.mxu0 %v1376_v19  ;;  %1240 = vmatprep.subr.bf16.mxu1 %v1672_v0  ;;  %v1412_v19 = vld [vmem:[%s2023_s11] sm:$0xff]  }
  0xd1   :  { %v1116_v25 = vld [vmem:[#allocation13] ss:$0 sm:$0xff] }
  0xd3   :  { %1167 = vmatpush3.bf16.msra.mxu0 %v1377_v21  ;;  %1241 = vmatpush3.bf16.msra.mxu1 %v1386_v26  ;;  %v1414_v21 = vld [vmem:[%s2023_s11 + $0x10] sm:$0xff]  }
  0xd4   :  { %1248 = vmatprep.subr.bf16.mxu0 %v1672_v0  ;;  %1242 = vmatprep.subr.bf16.mxu1 %v1672_v0 }
  0xd6   :  { %354 = vmatmul.mubr.bf16.vlgmr.msra.gmra.mrb[0].mxu0 %v1079_v23  ;;  %v1416_v23 = vld [vmem:[%s2023_s11 + $0x20] sm:$0xff]  }
  0xd7   :  { %1264 = vmatprep.mubr.msk.bf16.mxu0 %vm1673_vm0, %v1672_v0  ;;  %1243 = vmatpush3.bf16.msra.mxu1 %v1387_v27 }
  0xd8   :  { %1268 = vmatprep.subr.bf16.mxu1 %v1672_v0  ;;  %1249 = vmatpush3.bf16.msra.mxu0 %v1388_v28 }
  0xd9   :  { %1250 = vmatprep.subr.bf16.mxu0 %v1672_v0 }
  0xdc   :  { %1251 = vmatpush3.bf16.msra.mxu0 %v1389_v29 }
  0xdd   :  { %1252 = vmatprep.subr.bf16.mxu0 %v1672_v0 }
  0xe0   :  { %1253 = vmatpush3.bf16.msra.mxu0 %v1390_v30 }
  0xe1   :  { %1254 = vmatprep.subr.bf16.mxu0 %v1672_v0 }
  0xe4   :  { %1255 = vmatpush3.bf16.msra.mxu0 %v1391_v31 }
  0xe5   :  { %1256 = vmatprep.subr.bf16.mxu0 %v1672_v0 }
  0xe8   :  { %1257 = vmatpush3.bf16.msra.mxu0 %v1392_v32 }
  0xe9   :  { %1258 = vmatprep.subr.bf16.mxu0 %v1672_v0 }
  0xec   :  { %1259 = vmatpush3.bf16.msra.mxu0 %v1393_v43 }
  0xed   :  { %1260 = vmatprep.subr.bf16.mxu0 %v1672_v0 }
  0xf0   :  { %1261 = vmatpush3.bf16.msra.mxu0 %v1394_v44 }
  0xf1   :  { %1262 = vmatprep.subr.bf16.mxu0 %v1672_v0 }
  0xf4   :  { %1263 = vmatpush3.bf16.msra.mxu0 %v1395_v45 }
  0xf5   :  { %1288 = vmatprep.subr.bf16.mxu0 %v1672_v0 }
 0x1a9   :  { %v1168_v33 = vpop.f32.mrb[0].mxu0 }
 0x1aa   :  { %v1169_v34 = vpop.f32.mrb[1].mxu0 }
 0x1ab   :  { %v1170_v36 = vadd.f32 %v1169_v34, %v1168_v33  ;;  %v1171_v37 = vpop.f32.mrb[2].mxu0  ;;  %v1418_v34 = vld [vmem:[%s2023_s11 + $0x30] sm:$0xff]  }
 0x1ac   :  { %v1172_v38 = vpop.f32.mrb[3].mxu0  ;;  %v1421_v37 = vld [vmem:[#allocation17 + $0x8] sm:$0xff]  }
 0x1ad   :  { %v374_v39 = vadd.f32 %v1170_v36, %v1097_v35  ;;  %v1419_v35 = vld [vmem:[%s2023_s11 + $0x38] sm:$0xff]   ;;  %v1420_v36 = vld [vmem:[#allocation17] sm:$0xff]  }
 0x1ae   :  { %v1422_v38 = vld [vmem:[#allocation17 + $0x10] sm:$0xff]  }
 0x1af   :  { %v376_v40 = vmul.f32 0.01, %v374_v39  ;;  %vm375_vm1 = vcmp.ge.f32.partialorder %v374_v39, 0.0 }
 0x1b1   :  { %v377_v41 = vsel %vm375_vm1, %v374_v39, %v376_v40  ;;  %v1423_v39 = vld [vmem:[#allocation17 + $0x18] sm:$0xff]   ;;  %v1424_v40 = vld [vmem:[#allocation17 + $0x20] sm:$0xff]  }
 0x1b2   :  { %v378_v42 = vpack.c.bf16 %v377_v41, %v377_v41  ;;  %v1425_v41 = vld [vmem:[#allocation17 + $0x28] sm:$0xff]  }
 0x1b4   :  { %1245 = vmatmul.mubr.bf16.vlgmr.msra.gmra.mrb[0].mxu1 %v378_v42  ;;  %v1125_v42 = vld [vmem:[#allocation16] ss:$0 sm:$0xff] }
 0x1b5   :  { %1284 = vmatprep.mubr.msk.bf16.mxu1 %vm1673_vm0, %v1672_v0  ;;  %1269 = vmatpush3.bf16.msra.mxu1 %v1396_v46 }
 0x1b6   :  { %1270 = vmatprep.subr.bf16.mxu1 %v1672_v0 }
 0x1b9   :  { %1271 = vmatpush3.bf16.msra.mxu1 %v1397_v47 }
 0x1ba   :  { %1272 = vmatprep.subr.bf16.mxu1 %v1672_v0 }
 0x1bd   :  { %1273 = vmatpush3.bf16.msra.mxu1 %v1398_v48 }
 0x1be   :  { %1274 = vmatprep.subr.bf16.mxu1 %v1672_v0 }
 0x1c1   :  { %1275 = vmatpush3.bf16.msra.mxu1 %v1399_v49 }
 0x1c2   :  { %1276 = vmatprep.subr.bf16.mxu1 %v1672_v0 }
 0x1c5   :  { %1277 = vmatpush3.bf16.msra.mxu1 %v1400_v50 }
 0x1c6   :  { %1278 = vmatprep.subr.bf16.mxu1 %v1672_v0 }
 0x1c9   :  { %1279 = vmatpush3.bf16.msra.mxu1 %v1401_v51  ;;  %v1426_v51 = vld [vmem:[#allocation17 + $0x30] sm:$0xff]  }
 0x1ca   :  { %1280 = vmatprep.subr.bf16.mxu1 %v1672_v0 }
 0x1cd   :  { %1281 = vmatpush3.bf16.msra.mxu1 %v1402_v63 }
 0x1ce   :  { %1282 = vmatprep.subr.bf16.mxu1 %v1672_v0 }
 0x1d1   :  { %1283 = vmatpush3.bf16.msra.mxu1 %v1403_v1 }
 0x1d2   :  { %1308 = vmatprep.subr.bf16.mxu1 %v1672_v0 }
 0x287   :  { %v484_v53 = vpop.f32.mrb[0].mxu1 }
 0x288   :  { %v485_v54 = vadd.f32 %v1098_v52, %v484_v53  ;;  %v1246_v55 = vpop.f32.mrb[1].mxu1  ;;  %v1427_v52 = vld [vmem:[#allocation17 + $0x38] sm:$0xff]  }
 0x289   :  { %v487_v56 = vpop.f32.mrb[2].mxu1  ;;  %v1134_v53 = vld [vmem:[%s2024_s12] ss:$0 sm:$0xff] }
 0x28a   :  { %vm490_vm2 = vcmp.ge.f32.partialorder %v485_v54, 0.0  ;;  %v491_v57 = vmul.f32 0.01, %v485_v54  ;;  %v1247_v58 = vpop.f32.mrb[3].mxu1 }
 0x28c   :  { %v492_v59 = vsel %vm490_vm2, %v485_v54, %v491_v57 }
 0x28d   :  { %vm493_vm3 = vcmp.ge.f32.partialorder %v492_v59, 0.0  ;;  %v494_v60 = vmul.f32 0.01, %v492_v59 }
 0x28f   :  { %v495_v61 = vsel %vm493_vm3, %v492_v59, %v494_v60 }
 0x290   :  { %v496_v62 = vpack.c.bf16 %v495_v61, %v495_v61 }
 0x292   :  { %1265 = vmatmul.mubr.bf16.vlgmr.msra.gmra.mrb[4].mxu0 %v496_v62 }
 0x293   :  { %1304 = vmatprep.mubr.msk.bf16.mxu0 %vm1673_vm0, %v1672_v0  ;;  %1289 = vmatpush3.bf16.msra.mxu0 %v1404_v2 }
 0x294   :  { %1290 = vmatprep.subr.bf16.mxu0 %v1672_v0 }
 0x297   :  { %1291 = vmatpush3.bf16.msra.mxu0 %v1405_v3 }
 0x298   :  { %1292 = vmatprep.subr.bf16.mxu0 %v1672_v0 }
 0x29b   :  { %1293 = vmatpush3.bf16.msra.mxu0 %v1406_v4 }
 0x29c   :  { %1294 = vmatprep.subr.bf16.mxu0 %v1672_v0 }
 0x29f   :  { %1295 = vmatpush3.bf16.msra.mxu0 %v1407_v5 }
 0x2a0   :  { %1296 = vmatprep.subr.bf16.mxu0 %v1672_v0 }
 0x2a3   :  { %1297 = vmatpush3.bf16.msra.mxu0 %v1408_v6 }
 0x2a4   :  { %1298 = vmatprep.subr.bf16.mxu0 %v1672_v0 }
 0x2a7   :  { %1299 = vmatpush3.bf16.msra.mxu0 %v1409_v7 }
 0x2a8   :  { %1300 = vmatprep.subr.bf16.mxu0 %v1672_v0 }
 0x2ab   :  { %1301 = vmatpush3.bf16.msra.mxu0 %v1410_v17 }
 0x2ac   :  { %1302 = vmatprep.subr.bf16.mxu0 %v1672_v0 }
 0x2af   :  { %1303 = vmatpush3.bf16.msra.mxu0 %v1411_v18 }
 0x2b0   :  { %1328 = vmatprep.subr.bf16.mxu0 %v1672_v0 }
 0x365   :  { %v602_v9 = vpop.f32.mrb[4].mxu0 }
 0x366   :  { %v603_v10 = vadd.f32 %v1107_v8, %v602_v9  ;;  %v1266_v11 = vpop.f32.mrb[5].mxu0 }
 0x367   :  { %v605_v12 = vpop.f32.mrb[6].mxu0 }
 0x368   :  { %vm608_vm4 = vcmp.ge.f32.partialorder %v603_v10, 0.0  ;;  %v609_v13 = vmul.f32 0.01, %v603_v10  ;;  %v1267_v14 = vpop.f32.mrb[7].mxu0 }
 0x36a   :  { %v610_v15 = vsel %vm608_vm4, %v603_v10, %v609_v13 }
 0x36b   :  { %v611_v16 = vpack.c.bf16 %v610_v15, %v610_v15 }
 0x36d   :  { %1285 = vmatmul.mubr.bf16.vlgmr.msra.gmra.mrb[4].mxu1 %v611_v16 }
 0x36e   :  { %1324 = vmatprep.mubr.msk.bf16.mxu1 %vm1673_vm0, %v1672_v0  ;;  %1309 = vmatpush3.bf16.msra.mxu1 %v1412_v19 }
 0x36f   :  { %1310 = vmatprep.subr.bf16.mxu1 %v1672_v0 }
 0x372   :  { %1311 = vmatpush3.bf16.msra.mxu1 %v1413_v20 }
 0x373   :  { %1312 = vmatprep.subr.bf16.mxu1 %v1672_v0 }
 0x376   :  { %1313 = vmatpush3.bf16.msra.mxu1 %v1414_v21 }
 0x377   :  { %1314 = vmatprep.subr.bf16.mxu1 %v1672_v0 }
 0x37a   :  { %1315 = vmatpush3.bf16.msra.mxu1 %v1415_v22 }
 0x37b   :  { %1316 = vmatprep.subr.bf16.mxu1 %v1672_v0 }
 0x37e   :  { %1317 = vmatpush3.bf16.msra.mxu1 %v1416_v23 }
 0x37f   :  { %1318 = vmatprep.subr.bf16.mxu1 %v1672_v0 }
 0x382   :  { %1319 = vmatpush3.bf16.msra.mxu1 %v1417_v24 }
 0x383   :  { %1320 = vmatprep.subr.bf16.mxu1 %v1672_v0 }
 0x386   :  { %1321 = vmatpush3.bf16.msra.mxu1 %v1418_v34 }
 0x387   :  { %1322 = vmatprep.subr.bf16.mxu1 %v1672_v0 }
 0x38a   :  { %1323 = vmatpush3.bf16.msra.mxu1 %v1419_v35 }
 0x440   :  { %v717_v26 = vpop.f32.mrb[4].mxu1 }
 0x441   :  { %v718_v27 = vadd.f32 %v1116_v25, %v717_v26  ;;  %v1286_v28 = vpop.f32.mrb[5].mxu1 }
 0x442   :  { %v720_v29 = vpop.f32.mrb[6].mxu1 }
 0x443   :  { %vm723_vm5 = vcmp.ge.f32.partialorder %v718_v27, 0.0  ;;  %v724_v30 = vmul.f32 0.01, %v718_v27  ;;  %v1287_v31 = vpop.f32.mrb[7].mxu1 }
 0x445   :  { %v725_v32 = vsel %vm723_vm5, %v718_v27, %v724_v30 }
 0x446   :  { %v726_v33 = vpack.c.bf16 %v725_v32, %v725_v32 }
 0x448   :  { %1305 = vmatmul.mubr.bf16.vlgmr.msra.gmra.mrb[8].mxu0 %v726_v33 }
 0x449   :  { %1344 = vmatprep.mubr.msk.bf16.mxu0 %vm1673_vm0, %v1672_v0  ;;  %1329 = vmatpush3.bf16.msra.mxu0 %v1420_v36 }
 0x44a   :  { %1330 = vmatprep.subr.bf16.mxu0 %v1672_v0 }
 0x44d   :  { %1331 = vmatpush3.bf16.msra.mxu0 %v1421_v37 }
 0x44e   :  { %1332 = vmatprep.subr.bf16.mxu0 %v1672_v0 }
 0x451   :  { %1333 = vmatpush3.bf16.msra.mxu0 %v1422_v38 }
 0x452   :  { %1334 = vmatprep.subr.bf16.mxu0 %v1672_v0 }
 0x455   :  { %1335 = vmatpush3.bf16.msra.mxu0 %v1423_v39 }
 0x456   :  { %1336 = vmatprep.subr.bf16.mxu0 %v1672_v0 }
 0x459   :  { %1337 = vmatpush3.bf16.msra.mxu0 %v1424_v40 }
 0x45a   :  { %1338 = vmatprep.subr.bf16.mxu0 %v1672_v0 }
 0x45d   :  { %1339 = vmatpush3.bf16.msra.mxu0 %v1425_v41 }
 0x45e   :  { %1340 = vmatprep.subr.bf16.mxu0 %v1672_v0 }
 0x461   :  { %1341 = vmatpush3.bf16.msra.mxu0 %v1426_v51 }
 0x462   :  { %1342 = vmatprep.subr.bf16.mxu0 %v1672_v0  ;;  %v1143_v0 = vld [vmem:[%s2026_s14] ss:$0 sm:$0xff] }
 0x465   :  { %1343 = vmatpush3.bf16.msra.mxu0 %v1427_v52 }
 0x51b   :  { %v832_v43 = vpop.f32.mrb[8].mxu0 }
 0x51c   :  { %v833_v44 = vadd.f32 %v1125_v42, %v832_v43  ;;  %v1306_v45 = vpop.f32.mrb[9].mxu0 }
 0x51d   :  { %v835_v46 = vpop.f32.mrb[10].mxu0 }
 0x51e   :  { %vm838_vm6 = vcmp.ge.f32.partialorder %v833_v44, 0.0  ;;  %v839_v47 = vmul.f32 0.01, %v833_v44  ;;  %v1307_v48 = vpop.f32.mrb[11].mxu0 }
 0x520   :  { %v840_v49 = vsel %vm838_vm6, %v833_v44, %v839_v47 }
 0x521   :  { %v841_v50 = vpack.c.bf16 %v840_v49, %v840_v49 }
 0x523   :  { %1325 = vmatmul.mubr.bf16.vlgmr.msra.gmra.mrb[8].mxu1 %v841_v50 }
 0x5f6   :  { %v947_v54 = vpop.f32.mrb[8].mxu1 }
 0x5f7   :  { %v948_v55 = vadd.f32 %v1134_v53, %v947_v54  ;;  %v1326_v56 = vpop.f32.mrb[9].mxu1 }
 0x5f8   :  { %v950_v57 = vpop.f32.mrb[10].mxu1 }
 0x5f9   :  { %vm953_vm7 = vcmp.ge.f32.partialorder %v948_v55, 0.0  ;;  %v954_v58 = vmul.f32 0.01, %v948_v55  ;;  %v1327_v59 = vpop.f32.mrb[11].mxu1 }
 0x5fb   :  { %v955_v60 = vsel %vm953_vm7, %v948_v55, %v954_v58 }
 0x5fc   :  { %v956_v61 = vpack.c.bf16 %v955_v60, %v955_v60 }
 0x5fe   :  { %1345 = vmatmul.mubr.bf16.vlgmr.msra.gmra.mrb[12].mxu0 %v956_v61 }
 0x6d1   :  { %v1062_v62 = vpop.f32.mrb[12].mxu0 }
 0x6d2   :  { %v1063_v63 = vadd.f32 %v1143_v0, %v1062_v62  ;;  %v1346_v1 = vpop.f32.mrb[13].mxu0 }
 0x6d3   :  { %v1065_v2 = vpop.f32.mrb[14].mxu0 }
 0x6d4   :  { %1068 = vst [vmem:[%s2027_s15] sm:$0xff] %v1063_v63  ;;  %v1347_v3 = vpop.f32.mrb[15].mxu0 }
 0x6d5   :  { %1073 = vsyncpa [#allocation4], 1 }
 0x6d6   :  { %1074 = vsyncpa [#allocation6], 1 }
 0x6d7   :  { %1075 = vsyncpa [#allocation9], 1 }
 0x6d8   :  { %1076 = vsyncpa [#allocation12], 1 }
 0x6d9   :  { %1077 = vsyncpa [#allocation15], 1 }
 0x6da   :  { %1078 = vsyncpa [#allocation18], 1 }

</bundles_post_ra>
